<compile_context>
chip_gen: v5e
topology: v5e:2x2
jax: 0.10.0
libtpu: 0.0.40
codegen_flags: <defaults>
</compile_context>

<pallas_src>
import numpy as np
import jax
import jax.numpy as jnp
from jax import lax
from jax.experimental import pallas as pl
from jax.experimental.pallas import tpu as pltpu

# ----------------------------- static config --------------------------------
B     = 2        # batch
C_IN  = 4        # args.n_channels  (EEG electrodes -> conv "height")
T     = 16       # args.freq_time   (time samples  -> conv "width"); freq = T
NCLS  = 4        # args.n_classes

K1   = T // 2                    # 8   conv1 temporal kernel width
P1   = T // 4                    # 4   conv1 / conv3 temporal padding
TPAD = T + 2 * P1                # 24  time axis after conv1 zero padding
H1   = C_IN + 2                  # 6   height after conv1 (pad 1, kh=1)
H1P  = 8                         # 8   height padded up to a full sublane tile
W1   = TPAD - K1 + 1             # 17  width  after conv1
H2   = H1 - C_IN + 1             # 3   height after grouped spatial conv2
WP1  = W1 // 4                   # 4   width after AvgPool2d((1, 4))
K3   = T // 4                    # 4   depthwise conv3 kernel width
WPAD = WP1 + 2 * P1              # 12  width after conv3 zero padding
W3   = WPAD - K3 + 1             # 9   width after conv3 / conv4
WP2  = W3 // 8                   # 1   width after AvgPool2d((1, 8))
NROW = 8 * H2                    # 24  stacked (channel, height) rows
NFEAT = 8 * H2 * WP2             # 24  flattened feature count (= n_outputs)


def _elu(x):
    return jnp.where(x > 0, x, jnp.exp(jnp.minimum(x, 0.0)) - 1.0)


# ------------------------------- kernel -------------------------------------
def eegnet4_kernel(
    xp_ref,      # (B, H1P, TPAD)  VMEM  zero-padded input (height padded to 8)
    w12_ref,     # (NROW, K1*H1P)  VMEM  fused conv1*BN1*conv2*BN2 weight
    b12_ref,     # (NROW, 1)       VMEM  fused bias per (channel, height) row
    pool4_ref,   # (W1, WPAD)      VMEM  AvgPool(1,4) + zero-pad(0,P1) matrix
    w3c_ref,     # (NROW, K3)      VMEM  depthwise conv3 taps per row
    b3c_ref,     # (NROW, 1)       VMEM  conv3 bias per row
    w4bn_ref,    # (NROW, NROW)    VMEM  conv4(1x1)+BN3 scale: kron(s3*w4, I_H2)
    b4c_ref,     # (NROW, 1)       VMEM  conv4 bias + BN3 shift per row
    wl_ref,      # (NCLS, NFEAT)   VMEM  classifier weight
    blc_ref,     # (NCLS, 1)       VMEM  classifier bias column
    out_ref,     # (NCLS, B)       VMEM  logits (transposed; wrapper returns .T)
):
    # Hoist all parameter loads out of the (unrolled) batch loop.
    w12 = w12_ref[...]
    b12 = b12_ref[...]
    pool4 = pool4_ref[...]
    w3c = w3c_ref[...]
    b3c = b3c_ref[...]
    w4bn = w4bn_ref[...]
    b4c = b4c_ref[...]
    wl = wl_ref[...]
    blc = blc_ref[...]

    for b in range(B):                         # B = 2, unrolled in ONE launch
        xpb = xp_ref[b]                        # (H1P, TPAD)

        # im2col over the K1 temporal taps (each lane slice hoisted exactly
        # once); row = k * H1P + h, col = output time position.
        xim = jnp.concatenate([xpb[:, k:k + W1] for k in range(K1)], axis=0)   # (64, W1)

        # conv1 + BN1 + conv2(+bias) + BN2 + ELU: one matmul, one bias add,
        # one ELU on the channel-stacked slab.
        a2 = _elu(jnp.dot(w12, xim, preferred_element_type=jnp.float32) + b12)  # (24, W1)

        # AvgPool2d((1, 4)) + zero padding (0, P1) for conv3: one right-matmul
        # with a constant pooling/scatter matrix (no per-column masked stores).
        pp = jnp.dot(a2, pool4, preferred_element_type=jnp.float32)             # (24, WPAD)
        # Dropout(p=0.25): identity in eval mode.

        # Depthwise conv3 (groups=8): K3 broadcast FMAs with per-row weights.
        a3 = b3c + w3c[:, 0:1] * pp[:, 0:W3]
        for k in range(1, K3):
            a3 = a3 + w3c[:, k:k + 1] * pp[:, k:k + W3]                          # (24, W3)

        # conv4 (1x1) + BN3 + ELU: one row-mixing matmul + bias + one ELU.
        a4 = _elu(jnp.dot(w4bn, a3, preferred_element_type=jnp.float32) + b4c)   # (24, W3)
        # Dropout(p=0.25): identity in eval mode.

        # AvgPool2d((1, 8)) -> width 1; flatten order == row order (o*H2 + h2).
        feat = jnp.sum(a4[:, 0:8 * WP2], axis=1, keepdims=True) * 0.125          # (24, 1)

        # Linear classifier (clf Dropout(p=0.2) is identity in eval mode).
        out_ref[:, b:b + 1] = (
            jnp.dot(wl, feat, preferred_element_type=jnp.float32) + blc)         # (NCLS, 1)


# --------------------- parameter folding (JAX glue) --------------------------
def _fold_params(params):
    eps = 1e-5

    def fold(g, b, m, v):                       # eval-mode BN -> affine
        s = g / jnp.sqrt(v + eps)
        return s, b - m * s

    s1, t1 = fold(params["g1"], params["be1"], params["m1"], params["v1"])
    s2, t2 = fold(params["g2"], params["be2"], params["m2"], params["v2"])
    s3, t3 = fold(params["g3"], params["be3"], params["m3"], params["v3"])

    w1, w2, w3, w4 = params["w1"], params["w2"], params["w3"], params["w4"]
    grp = jnp.array([o // 2 for o in range(8)], jnp.int32)   # conv2 groups=4

    # conv1+BN1+conv2+BN2 folded into a (24, 64) matrix acting on the im2col
    # slab (slab row k*H1P + h holds xp[h, w+k]).
    sel = np.zeros((H2, H1P, C_IN), np.float32)              # structure tensor
    for h2 in range(H2):
        for kh in range(C_IN):
            sel[h2, h2 + kh, kh] = 1.0
    w2h = jnp.einsum('xpk,ok->oxp', jnp.asarray(sel), w2)    # (8, H2, H1P)
    w12 = ((s2 * s1[grp])[:, None, None, None]
           * w1[grp][:, None, :, None]                       # (8, 1, K1, 1)
           * w2h[:, :, None, :])                             # (8, H2, 1, H1P)
    w12 = w12.reshape(NROW, K1 * H1P)                        # (24, 64)
    b12 = s2 * (params["b2"] + t1[grp] * jnp.sum(w2, axis=1)) + t2
    b12 = jnp.repeat(b12, H2)[:, None]                       # (24, 1)

    # AvgPool2d((1, 4)) then zero-pad (0, P1), as one constant width matrix.
    pmat = np.zeros((W1, WPAD), np.float32)
    for j in range(WP1):
        pmat[4 * j:4 * j + 4, P1 + j] = 0.25
    pool4 = jnp.asarray(pmat)

    w3c = jnp.repeat(w3, H2, axis=0)                         # (24, K3)
    b3c = jnp.repeat(params["b3"], H2)[:, None]              # (24, 1)

    w4bn = jnp.kron(s3[:, None] * w4, jnp.eye(H2, dtype=jnp.float32))   # (24, 24)
    b4c = jnp.repeat(s3 * params["b4"] + t3, H2)[:, None]    # (24, 1)

    return (w12, b12, pool4, w3c, b3c, w4bn, b4c,
            params["wl"], params["bl"][:, None])


# ------------------------------- wrapper -------------------------------------
def eegnet4_forward(x, params):
    """x: (B, 1, C_IN, T) float32 (NCHW, same as the PyTorch module)."""
    # conv1 padding (1, P1) on (height, width), plus 2 extra zero rows at the
    # bottom so every im2col slice is a full 8-sublane tile (the extra rows hit
    # all-zero columns of the fused weight matrix, so they are inert).
    xp = jnp.pad(x[:, 0].astype(jnp.float32),
                 ((0, 0), (1, 1 + (H1P - H1)), (P1, P1)))    # (B, 8, 24)

    (w12, b12, pool4, w3c, b3c, w4bn, b4c, wl, blc) = _fold_params(params)

    vmem = lambda: pl.BlockSpec(memory_space=pltpu.MemorySpace.VMEM)
    out = pl.pallas_call(
        eegnet4_kernel,
        out_shape=jax.ShapeDtypeStruct((NCLS, B), jnp.float32),
        in_specs=[vmem() for _ in range(10)],
        out_specs=vmem(),
    )(xp, w12, b12, pool4, w3c, b3c, w4bn, b4c, wl, blc)
    return out.T                                             # (B, NCLS)


# ---------------------- deterministic parameter init -------------------------
def init_params(key):
    ks = jax.random.split(key, 20)
    nrm = lambda k, shape, s=0.3: s * jax.random.normal(k, shape, jnp.float32)
    p = dict(
        w1=nrm(ks[0], (4, K1)),
        g1=1.0 + 0.1 * jax.random.normal(ks[1], (4,)), be1=nrm(ks[2], (4,), 0.1),
        m1=nrm(ks[3], (4,), 0.1), v1=0.5 + jax.random.uniform(ks[4], (4,)),
        w2=nrm(ks[5], (8, C_IN)), b2=nrm(ks[6], (8,), 0.1),
        g2=1.0 + 0.1 * jax.random.normal(ks[7], (8,)), be2=nrm(ks[8], (8,), 0.1),
        m2=nrm(ks[9], (8,), 0.1), v2=0.5 + jax.random.uniform(ks[10], (8,)),
        w3=nrm(ks[11], (8, K3)), b3=nrm(ks[12], (8,), 0.1),
        w4=nrm(ks[13], (8, 8)), b4=nrm(ks[14], (8,), 0.1),
        g3=1.0 + 0.1 * jax.random.normal(ks[15], (8,)), be3=nrm(ks[16], (8,), 0.1),
        m3=nrm(ks[17], (8,), 0.1), v3=0.5 + jax.random.uniform(ks[18], (8,)),
        wl=nrm(ks[19], (NCLS, NFEAT)),
    )
    p["bl"] = jnp.linspace(-0.1, 0.1, NCLS).astype(jnp.float32)
    return p


# ------------------------- pure-JAX reference (check) ------------------------
def eegnet4_reference(x, params):
    eps = 1e-5
    def fold(g, b, m, v):
        s = g / jnp.sqrt(v + eps)
        return s, b - m * s
    def bn(y, s, t):
        return y * s[None, :, None, None] + t[None, :, None, None]
    def conv(y, w, padding, groups=1):
        return lax.conv_general_dilated(
            y, w, (1, 1), padding,
            dimension_numbers=("NCHW", "OIHW", "NCHW"),
            feature_group_count=groups)
    def pool_w(y, k):
        return lax.reduce_window(y, jnp.float32(0.0), lax.add,
                                 (1, 1, 1, k), (1, 1, 1, k), "VALID") / k

    s1, t1 = fold(params["g1"], params["be1"], params["m1"], params["v1"])
    s2, t2 = fold(params["g2"], params["be2"], params["m2"], params["v2"])
    s3, t3 = fold(params["g3"], params["be3"], params["m3"], params["v3"])

    y = conv(x, params["w1"].reshape(4, 1, 1, K1), [(1, 1), (P1, P1)])
    y = bn(y, s1, t1)
    y = conv(y, params["w2"].reshape(8, 1, C_IN, 1), "VALID", groups=4)
    y = y + params["b2"][None, :, None, None]
    y = _elu(bn(y, s2, t2))
    y = pool_w(y, 4)
    y = conv(y, params["w3"].reshape(8, 1, 1, K3), [(0, 0), (P1, P1)], groups=8)
    y = y + params["b3"][None, :, None, None]
    y = conv(y, params["w4"].reshape(8, 8, 1, 1), "VALID")
    y = y + params["b4"][None, :, None, None]
    y = _elu(bn(y, s3, t3))
    y = pool_w(y, 8)
    y = y.reshape(y.shape[0], -1)
    return y @ params["wl"].T + params["bl"]


if __name__ == "__main__":
    key = jax.random.PRNGKey(0)
    kx, kp = jax.random.split(key)
    x = jax.random.normal(kx, (B, 1, C_IN, T), jnp.float32)
    params = init_params(kp)

    out = jax.block_until_ready(eegnet4_forward(x, params))
    ref = eegnet4_reference(x, params)

    assert out.shape == (B, NCLS), out.shape
    # Tolerance leaves headroom for the MXU's multi-pass f32 matmul rounding;
    # genuine indexing / fusion bugs produce O(0.1) errors.
    if not jnp.allclose(out, ref, atol=5e-3, rtol=5e-3):
        raise AssertionError(
            f"kernel/reference mismatch, max abs err = {jnp.max(jnp.abs(out - ref))}")
    print("KERNEL_OK")
</pallas_src>

<mosaic_0001>
module attributes {stable_mosaic.version = 11 : i64} {
  func.func @eegnet4_kernel(%arg0: memref<2x8x24xf32, #tpu.memory_space<vmem>>, %arg1: memref<24x64xf32, #tpu.memory_space<vmem>>, %arg2: memref<24x1xf32, #tpu.memory_space<vmem>>, %arg3: memref<17x12xf32, #tpu.memory_space<vmem>>, %arg4: memref<24x4xf32, #tpu.memory_space<vmem>>, %arg5: memref<24x1xf32, #tpu.memory_space<vmem>>, %arg6: memref<24x24xf32, #tpu.memory_space<vmem>>, %arg7: memref<24x1xf32, #tpu.memory_space<vmem>>, %arg8: memref<4x24xf32, #tpu.memory_space<vmem>>, %arg9: memref<4x1xf32, #tpu.memory_space<vmem>>, %arg10: memref<4x2xf32, #tpu.memory_space<vmem>>) attributes {dimension_semantics = [], scalar_prefetch = 0 : i64, scratch_operands = 0 : i64, tpu.core_type = #tpu.core_type<tc>} {
    %c0 = arith.constant 0 : index
    %c0_0 = arith.constant 0 : index
    %0 = vector.load %arg1[%c0, %c0_0] : memref<24x64xf32, #tpu.memory_space<vmem>>, vector<24x64xf32>
    %c0_1 = arith.constant 0 : index
    %c0_2 = arith.constant 0 : index
    %1 = vector.load %arg2[%c0_1, %c0_2] : memref<24x1xf32, #tpu.memory_space<vmem>>, vector<24x1xf32>
    %c0_3 = arith.constant 0 : index
    %c0_4 = arith.constant 0 : index
    %2 = vector.load %arg3[%c0_3, %c0_4] : memref<17x12xf32, #tpu.memory_space<vmem>>, vector<17x12xf32>
    %c0_5 = arith.constant 0 : index
    %c0_6 = arith.constant 0 : index
    %3 = vector.load %arg4[%c0_5, %c0_6] : memref<24x4xf32, #tpu.memory_space<vmem>>, vector<24x4xf32>
    %c0_7 = arith.constant 0 : index
    %c0_8 = arith.constant 0 : index
    %4 = vector.load %arg5[%c0_7, %c0_8] : memref<24x1xf32, #tpu.memory_space<vmem>>, vector<24x1xf32>
    %c0_9 = arith.constant 0 : index
    %c0_10 = arith.constant 0 : index
    %5 = vector.load %arg6[%c0_9, %c0_10] : memref<24x24xf32, #tpu.memory_space<vmem>>, vector<24x24xf32>
    %c0_11 = arith.constant 0 : index
    %c0_12 = arith.constant 0 : index
    %6 = vector.load %arg7[%c0_11, %c0_12] : memref<24x1xf32, #tpu.memory_space<vmem>>, vector<24x1xf32>
    %c0_13 = arith.constant 0 : index
    %c0_14 = arith.constant 0 : index
    %7 = vector.load %arg8[%c0_13, %c0_14] : memref<4x24xf32, #tpu.memory_space<vmem>>, vector<4x24xf32>
    %c0_15 = arith.constant 0 : index
    %c0_16 = arith.constant 0 : index
    %8 = vector.load %arg9[%c0_15, %c0_16] : memref<4x1xf32, #tpu.memory_space<vmem>>, vector<4x1xf32>
    %c0_17 = arith.constant 0 : index
    %c0_18 = arith.constant 0 : index
    %c0_19 = arith.constant 0 : index
    %9 = vector.load %arg0[%c0_17, %c0_18, %c0_19] : memref<2x8x24xf32, #tpu.memory_space<vmem>>, vector<1x8x24xf32>
    %10 = vector.shape_cast %9 : vector<1x8x24xf32> to vector<8x24xf32>
    %11 = vector.extract_strided_slice %10 {offsets = [0, 0], sizes = [8, 17], strides = [1, 1]} : vector<8x24xf32> to vector<8x17xf32>
    %12 = vector.extract_strided_slice %10 {offsets = [0, 1], sizes = [8, 17], strides = [1, 1]} : vector<8x24xf32> to vector<8x17xf32>
    %13 = vector.extract_strided_slice %10 {offsets = [0, 2], sizes = [8, 17], strides = [1, 1]} : vector<8x24xf32> to vector<8x17xf32>
    %14 = vector.extract_strided_slice %10 {offsets = [0, 3], sizes = [8, 17], strides = [1, 1]} : vector<8x24xf32> to vector<8x17xf32>
    %15 = vector.extract_strided_slice %10 {offsets = [0, 4], sizes = [8, 17], strides = [1, 1]} : vector<8x24xf32> to vector<8x17xf32>
    %16 = vector.extract_strided_slice %10 {offsets = [0, 5], sizes = [8, 17], strides = [1, 1]} : vector<8x24xf32> to vector<8x17xf32>
    %17 = vector.extract_strided_slice %10 {offsets = [0, 6], sizes = [8, 17], strides = [1, 1]} : vector<8x24xf32> to vector<8x17xf32>
    %18 = vector.extract_strided_slice %10 {offsets = [0, 7], sizes = [8, 17], strides = [1, 1]} : vector<8x24xf32> to vector<8x17xf32>
    %19 = tpu.concatenate %11, %12, %13, %14, %15, %16, %17, %18 in 0 : vector<8x17xf32>, vector<8x17xf32>, vector<8x17xf32>, vector<8x17xf32>, vector<8x17xf32>, vector<8x17xf32>, vector<8x17xf32>, vector<8x17xf32> -> vector<64x17xf32>
    %cst = arith.constant dense<0.000000e+00> : vector<24x17xf32>
    %20 = tpu.matmul %0, %19, %cst {dimension_numbers = #tpu.dot_dimension_numbers<[1], [0], [0], [1], [0, 0, 1, 1], [], []>} : vector<24x64xf32>, vector<64x17xf32>, vector<24x17xf32> -> vector<24x17xf32>
    %21 = vector.broadcast %1 : vector<24x1xf32> to vector<24x17xf32>
    %22 = arith.addf %20, %21 : vector<24x17xf32>
    %cst_20 = arith.constant 0.000000e+00 : f32
    %23 = vector.broadcast %cst_20 : f32 to vector<24x17xf32>
    %24 = arith.cmpf ogt, %22, %23 : vector<24x17xf32>
    %cst_21 = arith.constant 0.000000e+00 : f32
    %25 = vector.broadcast %cst_21 : f32 to vector<24x17xf32>
    %26 = arith.minimumf %22, %25 : vector<24x17xf32>
    %27 = math.exp %26 : vector<24x17xf32>
    %cst_22 = arith.constant 1.000000e+00 : f32
    %28 = vector.broadcast %cst_22 : f32 to vector<24x17xf32>
    %29 = arith.subf %27, %28 : vector<24x17xf32>
    %30 = arith.select %24, %22, %29 : vector<24x17xi1>, vector<24x17xf32>
    %cst_23 = arith.constant dense<0.000000e+00> : vector<24x12xf32>
    %31 = tpu.matmul %30, %2, %cst_23 {dimension_numbers = #tpu.dot_dimension_numbers<[1], [0], [0], [1], [0, 0, 1, 1], [], []>} : vector<24x17xf32>, vector<17x12xf32>, vector<24x12xf32> -> vector<24x12xf32>
    %32 = vector.extract_strided_slice %3 {offsets = [0, 0], sizes = [24, 1], strides = [1, 1]} : vector<24x4xf32> to vector<24x1xf32>
    %33 = vector.extract_strided_slice %31 {offsets = [0, 0], sizes = [24, 9], strides = [1, 1]} : vector<24x12xf32> to vector<24x9xf32>
    %34 = vector.broadcast %32 : vector<24x1xf32> to vector<24x9xf32>
    %35 = arith.mulf %34, %33 : vector<24x9xf32>
    %36 = vector.broadcast %4 : vector<24x1xf32> to vector<24x9xf32>
    %37 = arith.addf %36, %35 : vector<24x9xf32>
    %38 = vector.extract_strided_slice %3 {offsets = [0, 1], sizes = [24, 1], strides = [1, 1]} : vector<24x4xf32> to vector<24x1xf32>
    %39 = vector.extract_strided_slice %31 {offsets = [0, 1], sizes = [24, 9], strides = [1, 1]} : vector<24x12xf32> to vector<24x9xf32>
    %40 = vector.broadcast %38 : vector<24x1xf32> to vector<24x9xf32>
    %41 = arith.mulf %40, %39 : vector<24x9xf32>
    %42 = arith.addf %37, %41 : vector<24x9xf32>
    %43 = vector.extract_strided_slice %3 {offsets = [0, 2], sizes = [24, 1], strides = [1, 1]} : vector<24x4xf32> to vector<24x1xf32>
    %44 = vector.extract_strided_slice %31 {offsets = [0, 2], sizes = [24, 9], strides = [1, 1]} : vector<24x12xf32> to vector<24x9xf32>
    %45 = vector.broadcast %43 : vector<24x1xf32> to vector<24x9xf32>
    %46 = arith.mulf %45, %44 : vector<24x9xf32>
    %47 = arith.addf %42, %46 : vector<24x9xf32>
    %48 = vector.extract_strided_slice %3 {offsets = [0, 3], sizes = [24, 1], strides = [1, 1]} : vector<24x4xf32> to vector<24x1xf32>
    %49 = vector.extract_strided_slice %31 {offsets = [0, 3], sizes = [24, 9], strides = [1, 1]} : vector<24x12xf32> to vector<24x9xf32>
    %50 = vector.broadcast %48 : vector<24x1xf32> to vector<24x9xf32>
    %51 = arith.mulf %50, %49 : vector<24x9xf32>
    %52 = arith.addf %47, %51 : vector<24x9xf32>
    %cst_24 = arith.constant dense<0.000000e+00> : vector<24x9xf32>
    %53 = tpu.matmul %5, %52, %cst_24 {dimension_numbers = #tpu.dot_dimension_numbers<[1], [0], [0], [1], [0, 0, 1, 1], [], []>} : vector<24x24xf32>, vector<24x9xf32>, vector<24x9xf32> -> vector<24x9xf32>
    %54 = vector.broadcast %6 : vector<24x1xf32> to vector<24x9xf32>
    %55 = arith.addf %53, %54 : vector<24x9xf32>
    %cst_25 = arith.constant 0.000000e+00 : f32
    %56 = vector.broadcast %cst_25 : f32 to vector<24x9xf32>
    %57 = arith.cmpf ogt, %55, %56 : vector<24x9xf32>
    %cst_26 = arith.constant 0.000000e+00 : f32
    %58 = vector.broadcast %cst_26 : f32 to vector<24x9xf32>
    %59 = arith.minimumf %55, %58 : vector<24x9xf32>
    %60 = math.exp %59 : vector<24x9xf32>
    %cst_27 = arith.constant 1.000000e+00 : f32
    %61 = vector.broadcast %cst_27 : f32 to vector<24x9xf32>
    %62 = arith.subf %60, %61 : vector<24x9xf32>
    %63 = arith.select %57, %55, %62 : vector<24x9xi1>, vector<24x9xf32>
    %64 = vector.extract_strided_slice %63 {offsets = [0, 0], sizes = [24, 8], strides = [1, 1]} : vector<24x9xf32> to vector<24x8xf32>
    %cst_28 = arith.constant dense<0.000000e+00> : vector<24xf32>
    %65 = vector.multi_reduction <add>, %64, %cst_28 [1] : vector<24x8xf32> to vector<24xf32>
    %66 = vector.shape_cast %65 : vector<24xf32> to vector<24x1xf32>
    %cst_29 = arith.constant 1.250000e-01 : f32
    %67 = vector.broadcast %cst_29 : f32 to vector<24x1xf32>
    %68 = arith.mulf %66, %67 : vector<24x1xf32>
    %cst_30 = arith.constant dense<0.000000e+00> : vector<4x1xf32>
    %69 = tpu.matmul %7, %68, %cst_30 {dimension_numbers = #tpu.dot_dimension_numbers<[1], [0], [0], [1], [0, 0, 1, 1], [], []>} : vector<4x24xf32>, vector<24x1xf32>, vector<4x1xf32> -> vector<4x1xf32>
    %70 = arith.addf %69, %8 : vector<4x1xf32>
    %c0_31 = arith.constant 0 : index
    %c0_32 = arith.constant 0 : index
    %71 = vector.load %arg10[%c0_31, %c0_32] : memref<4x2xf32, #tpu.memory_space<vmem>>, vector<4x1xf32>
    tpu.vector_store %arg10[%c0_31, %c0_32], %70 {strides = array<i32>} : memref<4x2xf32, #tpu.memory_space<vmem>>, vector<4x1xf32>,
    %c1 = arith.constant 1 : index
    %c0_33 = arith.constant 0 : index
    %c0_34 = arith.constant 0 : index
    %72 = vector.load %arg0[%c1, %c0_33, %c0_34] : memref<2x8x24xf32, #tpu.memory_space<vmem>>, vector<1x8x24xf32>
    %73 = vector.shape_cast %72 : vector<1x8x24xf32> to vector<8x24xf32>
    %74 = vector.extract_strided_slice %73 {offsets = [0, 0], sizes = [8, 17], strides = [1, 1]} : vector<8x24xf32> to vector<8x17xf32>
    %75 = vector.extract_strided_slice %73 {offsets = [0, 1], sizes = [8, 17], strides = [1, 1]} : vector<8x24xf32> to vector<8x17xf32>
    %76 = vector.extract_strided_slice %73 {offsets = [0, 2], sizes = [8, 17], strides = [1, 1]} : vector<8x24xf32> to vector<8x17xf32>
    %77 = vector.extract_strided_slice %73 {offsets = [0, 3], sizes = [8, 17], strides = [1, 1]} : vector<8x24xf32> to vector<8x17xf32>
    %78 = vector.extract_strided_slice %73 {offsets = [0, 4], sizes = [8, 17], strides = [1, 1]} : vector<8x24xf32> to vector<8x17xf32>
    %79 = vector.extract_strided_slice %73 {offsets = [0, 5], sizes = [8, 17], strides = [1, 1]} : vector<8x24xf32> to vector<8x17xf32>
    %80 = vector.extract_strided_slice %73 {offsets = [0, 6], sizes = [8, 17], strides = [1, 1]} : vector<8x24xf32> to vector<8x17xf32>
    %81 = vector.extract_strided_slice %73 {offsets = [0, 7], sizes = [8, 17], strides = [1, 1]} : vector<8x24xf32> to vector<8x17xf32>
    %82 = tpu.concatenate %74, %75, %76, %77, %78, %79, %80, %81 in 0 : vector<8x17xf32>, vector<8x17xf32>, vector<8x17xf32>, vector<8x17xf32>, vector<8x17xf32>, vector<8x17xf32>, vector<8x17xf32>, vector<8x17xf32> -> vector<64x17xf32>
    %cst_35 = arith.constant dense<0.000000e+00> : vector<24x17xf32>
    %83 = tpu.matmul %0, %82, %cst_35 {dimension_numbers = #tpu.dot_dimension_numbers<[1], [0], [0], [1], [0, 0, 1, 1], [], []>} : vector<24x64xf32>, vector<64x17xf32>, vector<24x17xf32> -> vector<24x17xf32>
    %84 = vector.broadcast %1 : vector<24x1xf32> to vector<24x17xf32>
    %85 = arith.addf %83, %84 : vector<24x17xf32>
    %cst_36 = arith.constant 0.000000e+00 : f32
    %86 = vector.broadcast %cst_36 : f32 to vector<24x17xf32>
    %87 = arith.cmpf ogt, %85, %86 : vector<24x17xf32>
    %cst_37 = arith.constant 0.000000e+00 : f32
    %88 = vector.broadcast %cst_37 : f32 to vector<24x17xf32>
    %89 = arith.minimumf %85, %88 : vector<24x17xf32>
    %90 = math.exp %89 : vector<24x17xf32>
    %cst_38 = arith.constant 1.000000e+00 : f32
    %91 = vector.broadcast %cst_38 : f32 to vector<24x17xf32>
    %92 = arith.subf %90, %91 : vector<24x17xf32>
    %93 = arith.select %87, %85, %92 : vector<24x17xi1>, vector<24x17xf32>
    %cst_39 = arith.constant dense<0.000000e+00> : vector<24x12xf32>
    %94 = tpu.matmul %93, %2, %cst_39 {dimension_numbers = #tpu.dot_dimension_numbers<[1], [0], [0], [1], [0, 0, 1, 1], [], []>} : vector<24x17xf32>, vector<17x12xf32>, vector<24x12xf32> -> vector<24x12xf32>
    %95 = vector.extract_strided_slice %3 {offsets = [0, 0], sizes = [24, 1], strides = [1, 1]} : vector<24x4xf32> to vector<24x1xf32>
    %96 = vector.extract_strided_slice %94 {offsets = [0, 0], sizes = [24, 9], strides = [1, 1]} : vector<24x12xf32> to vector<24x9xf32>
    %97 = vector.broadcast %95 : vector<24x1xf32> to vector<24x9xf32>
    %98 = arith.mulf %97, %96 : vector<24x9xf32>
    %99 = vector.broadcast %4 : vector<24x1xf32> to vector<24x9xf32>
    %100 = arith.addf %99, %98 : vector<24x9xf32>
    %101 = vector.extract_strided_slice %3 {offsets = [0, 1], sizes = [24, 1], strides = [1, 1]} : vector<24x4xf32> to vector<24x1xf32>
    %102 = vector.extract_strided_slice %94 {offsets = [0, 1], sizes = [24, 9], strides = [1, 1]} : vector<24x12xf32> to vector<24x9xf32>
    %103 = vector.broadcast %101 : vector<24x1xf32> to vector<24x9xf32>
    %104 = arith.mulf %103, %102 : vector<24x9xf32>
    %105 = arith.addf %100, %104 : vector<24x9xf32>
    %106 = vector.extract_strided_slice %3 {offsets = [0, 2], sizes = [24, 1], strides = [1, 1]} : vector<24x4xf32> to vector<24x1xf32>
    %107 = vector.extract_strided_slice %94 {offsets = [0, 2], sizes = [24, 9], strides = [1, 1]} : vector<24x12xf32> to vector<24x9xf32>
    %108 = vector.broadcast %106 : vector<24x1xf32> to vector<24x9xf32>
    %109 = arith.mulf %108, %107 : vector<24x9xf32>
    %110 = arith.addf %105, %109 : vector<24x9xf32>
    %111 = vector.extract_strided_slice %3 {offsets = [0, 3], sizes = [24, 1], strides = [1, 1]} : vector<24x4xf32> to vector<24x1xf32>
    %112 = vector.extract_strided_slice %94 {offsets = [0, 3], sizes = [24, 9], strides = [1, 1]} : vector<24x12xf32> to vector<24x9xf32>
    %113 = vector.broadcast %111 : vector<24x1xf32> to vector<24x9xf32>
    %114 = arith.mulf %113, %112 : vector<24x9xf32>
    %115 = arith.addf %110, %114 : vector<24x9xf32>
    %cst_40 = arith.constant dense<0.000000e+00> : vector<24x9xf32>
    %116 = tpu.matmul %5, %115, %cst_40 {dimension_numbers = #tpu.dot_dimension_numbers<[1], [0], [0], [1], [0, 0, 1, 1], [], []>} : vector<24x24xf32>, vector<24x9xf32>, vector<24x9xf32> -> vector<24x9xf32>
    %117 = vector.broadcast %6 : vector<24x1xf32> to vector<24x9xf32>
    %118 = arith.addf %116, %117 : vector<24x9xf32>
    %cst_41 = arith.constant 0.000000e+00 : f32
    %119 = vector.broadcast %cst_41 : f32 to vector<24x9xf32>
    %120 = arith.cmpf ogt, %118, %119 : vector<24x9xf32>
    %cst_42 = arith.constant 0.000000e+00 : f32
    %121 = vector.broadcast %cst_42 : f32 to vector<24x9xf32>
    %122 = arith.minimumf %118, %121 : vector<24x9xf32>
    %123 = math.exp %122 : vector<24x9xf32>
    %cst_43 = arith.constant 1.000000e+00 : f32
    %124 = vector.broadcast %cst_43 : f32 to vector<24x9xf32>
    %125 = arith.subf %123, %124 : vector<24x9xf32>
    %126 = arith.select %120, %118, %125 : vector<24x9xi1>, vector<24x9xf32>
    %127 = vector.extract_strided_slice %126 {offsets = [0, 0], sizes = [24, 8], strides = [1, 1]} : vector<24x9xf32> to vector<24x8xf32>
    %cst_44 = arith.constant dense<0.000000e+00> : vector<24xf32>
    %128 = vector.multi_reduction <add>, %127, %cst_44 [1] : vector<24x8xf32> to vector<24xf32>
    %129 = vector.shape_cast %128 : vector<24xf32> to vector<24x1xf32>
    %cst_45 = arith.constant 1.250000e-01 : f32
    %130 = vector.broadcast %cst_45 : f32 to vector<24x1xf32>
    %131 = arith.mulf %129, %130 : vector<24x1xf32>
    %cst_46 = arith.constant dense<0.000000e+00> : vector<4x1xf32>
    %132 = tpu.matmul %7, %131, %cst_46 {dimension_numbers = #tpu.dot_dimension_numbers<[1], [0], [0], [1], [0, 0, 1, 1], [], []>} : vector<4x24xf32>, vector<24x1xf32>, vector<4x1xf32> -> vector<4x1xf32>
    %133 = arith.addf %132, %8 : vector<4x1xf32>
    %c0_47 = arith.constant 0 : index
    %c1_48 = arith.constant 1 : index
    %134 = vector.load %arg10[%c0_47, %c1_48] : memref<4x2xf32, #tpu.memory_space<vmem>>, vector<4x1xf32>
    tpu.vector_store %arg10[%c0_47, %c1_48], %133 {strides = array<i32>} : memref<4x2xf32, #tpu.memory_space<vmem>>, vector<4x1xf32>,
    return
  }
}

</mosaic_0001>

<bundles_post_ra>
// kernel: tpu_custom_call.1
= control target key start
LH: loop header
LB: loop body
LE: loop exit
PB: predicated region body
PF: predicated region fallthrough
CT: control target
= control target key end

     0   :  { %s756_s15 = smov 121   ;;  %s757_s16 = smov 123   ;;  %v763_v2 = vmov 0   ;;  %v764_v10 = vmov 1   ;;  %v765_v14 = vmov 2   ;;  %vm96_vm0 = vcmask 523264   ;;  %s1094_s0 = inlined_call_operand.vmem [shape: f32[2,8,24], index: 0, kind: input, shape index: {}]   ;;  %s1095_s2 = inlined_call_operand.vmem [shape: f32[24,1], index: 2, kind: input, shape index: {}]   ;;  %s1096_s4 = inlined_call_operand.vmem [shape: f32[24,4], index: 4, kind: input, shape index: {}]   ;;  %s1097_s1 = inlined_call_operand.vmem [shape: f32[24,64], index: 1, kind: input, shape index: {}]   ;;  %s1098_s3 = inlined_call_operand.vmem [shape: f32[17,12], index: 3, kind: input, shape index: {}]   ;;  %s1099_s5 = inlined_call_operand.vmem [shape: f32[24,1], index: 5, kind: input, shape index: {}]   ;;  %s1100_s7 = inlined_call_operand.vmem [shape: f32[24,1], index: 7, kind: input, shape index: {}]   ;;  %s1101_s6 = inlined_call_operand.vmem [shape: f32[24,24], index: 6, kind: input, shape index: {}]   ;;  %s1102_s8 = inlined_call_operand.vmem [shape: f32[4,24], index: 8, kind: input, shape index: {}]   ;;  %s1103_s9 = inlined_call_operand.vmem [shape: f32[4,1], index: 9, kind: input, shape index: {}]   ;;  %s1104_s10 = inlined_call_operand.vmem [shape: f32[4,2], index: 10, kind: output, shape index: {}]  }
   0x1   :  { %v58_v0 = vld [vmem:[%s1094_s0] sm:$0xff]  ;;  %s758_s17 = smov 125   ;;  %s759_s18 = smov 122   ;;  %719 = vset.pattern.permute.xlu1 %v763_v2  ;;  %721 = vset.pattern.permute.xlu0 %v763_v2  ;;  %v40_v6 = vld [vmem:[%s1095_s2 + $0x10] sm:$0xff]  ;;  %v39_v7 = vld [vmem:[%s1095_s2 + $0x8] sm:$0xff]  ;;  %v766_v16 = vmov 3  }
   0x2   :  { %78 = vrot.lane.b32.xlu0 %v58_v0, %s756_s15  ;;  %72 = vrot.lane.b32.xlu1 %v58_v0, %s757_s16  ;;  %s760_s19 = smov 124   ;;  %s761_s20 = smov 126   ;;  %v38_v1 = vld [vmem:[%s1095_s2] sm:$0xff]  ;;  %v46_v8 = vld [vmem:[%s1096_s4 + $0x10] sm:$0xff]  ;;  %vm160_vm1 = vcmask 1040384   ;;  %vm150_vm2 = vcmask 138240  }
   0x3   :  { %66 = vrot.lane.b32.xlu2 %v58_v0, %s758_s17  ;;  %s762_s21 = smov 127   ;;  %v851_v15 = vld [vmem:[%s1097_s1] sm:$0xff]  ;;  %v858_v17 = vld [vmem:[%s1097_s1 + $0x8] sm:$0xff]  ;;  %v865_v18 = vld [vmem:[%s1097_s1 + $0x10] sm:$0xff]  ;;  %vm331_vm6 = vcmask 195584   ;;  %vm385_vm7 = vcmask 64512  }
   0x4   :  { %720 = vset.pattern.permute.xlu2 %v763_v2  ;;  %v45_v19 = vld [vmem:[%s1096_s4 + $0x8] sm:$0xff]  ;;  %v43_v20 = vld [vmem:[%s1098_s3 + $0x10] sm:$0x1]  ;;  %v41_v22 = vld [vmem:[%s1098_s3] sm:$0xff]  ;;  %vm421_vm11 = vcmask 3072  }
   0x5   :  { %678 = vmatpush.msk.msra.mxu1 %vm160_vm1, %v43_v20  ;;  %v42_v21 = vld [vmem:[%s1098_s3 + $0x8] sm:$0xff]  ;;  %v44_v23 = vld [vmem:[%s1096_s4] sm:$0xff]  ;;  %v49_v38 = vld [vmem:[%s1099_s5 + $0x10] sm:$0xff] }
   0x6   :  { %v47_v24 = vld [vmem:[%s1099_s5] sm:$0xff]  ;;  %v48_v46 = vld [vmem:[%s1099_s5 + $0x8] sm:$0xff] }
   0x7   :  { %178 = vmatpush.msra.mxu1 %v42_v21 }
   0x9   :  { %179 = vmatpush.msra.mxu1 %v41_v22 }
   0xa   :  { %75 = vrot.lane.b32.xlu0 %v58_v0, %s759_s18  ;;  %69 = vrot.lane.b32.xlu1 %v58_v0, %s760_s19 }
   0xb   :  { %63 = vrot.lane.b32.xlu2 %v58_v0, %s761_s20  ;;  %696 = vmatpush.msk.msrb.mxu1 %vm160_vm1, %v43_v20 }
   0xd   :  { %514 = vmatpush.msrb.mxu1 %v42_v21 }
   0xf   :  { %515 = vmatpush.msrb.mxu1 %v41_v22 }
  0x12   :  { %60 = vrot.lane.b32.xlu0 %v58_v0, %s762_s21  ;;  %83 = vperm.xlu1 %719, %v38_v1  }
  0x13   :  { %88 = vperm.xlu2 %720, %v39_v7   ;;  %v54_v7 = vld [vmem:[%s1100_s7 + $0x8] sm:$0xff] }
  0x1a   :  { %93 = vperm.xlu0 %721, %v40_v6   ;;  %722 = vset.pattern.permute.xlu1 %v764_v10 }
  0x1b   :  { %235 = vperm.xlu1 %722, %v46_v8   ;;  %723 = vset.pattern.permute.xlu2 %v764_v10  ;;  %v53_v10 = vld [vmem:[%s1100_s7] sm:$0xff] }
  0x1c   :  { %231 = vperm.xlu2 %723, %v45_v19  }
  0x22   :  { %725 = vset.pattern.permute.xlu0 %v765_v14 }
  0x23   :  { %724 = vset.pattern.permute.xlu1 %v765_v14  ;;  %261 = vperm.xlu0 %725, %v45_v19  }
  0x24   :  { %265 = vperm.xlu1 %724, %v46_v8   ;;  %227 = vperm.xlu2 %723, %v44_v23  }
  0x2b   :  { %729 = vset.pattern.permute.xlu0 %v763_v2 }
  0x2c   :  { %726 = vset.pattern.permute.xlu1 %v766_v16  ;;  %202 = vperm.xlu0 %729, %v46_v8  }
  0x2d   :  { %295 = vperm.xlu1 %726, %v46_v8   ;;  %727 = vset.pattern.permute.xlu2 %v765_v14 }
  0x2e   :  { %257 = vperm.xlu2 %727, %v44_v23  }
  0x35   :  { %291 = vperm.xlu1 %726, %v45_v19  }
  0x36   :  { %728 = vset.pattern.permute.xlu2 %v766_v16 }
  0x37   :  { %287 = vperm.xlu2 %728, %v44_v23  }
  0x3d   :  { %730 = vset.pattern.permute.xlu1 %v763_v2 }
  0x3e   :  { %197 = vperm.xlu1 %730, %v45_v19  }
  0x3f   :  { %731 = vset.pattern.permute.xlu2 %v763_v2 }
  0x40   :  { %220 = vperm.xlu2 %731, %v49_v38  }
  0x46   :  { %192 = vperm.xlu1 %730, %v44_v23  }
  0x48   :  { %215 = vperm.xlu2 %731, %v48_v46  }
  0x4e   :  { %210 = vperm.xlu1 %730, %v47_v24  }
  0x5d   :  { %v67_v5 = vpop.permute.xlu2 %66 }
  0x65   :  { %v64_v12 = vpop.permute.xlu2 %63 }
  0x6d   :  { %v892_v30 = vpop.permute.xlu2 %88 }
  0x74   :  { %v79_v3 = vpop.permute.xlu0 %78  ;;  %v73_v4 = vpop.permute.xlu1 %72 }
  0x75   :  { %114 = vmatpush.msra.mxu0 %v79_v3 }
  0x76   :  { %v908_v51 = vpop.permute.xlu2 %231 }
  0x7c   :  { %v76_v9 = vpop.permute.xlu0 %75  ;;  %v70_v11 = vpop.permute.xlu1 %69 }
  0x7d   :  { %115 = vmatpush.msra.mxu0 %v76_v9 }
  0x7e   :  { %v912_v53 = vpop.permute.xlu2 %227 }
  0x7f   :  { %116 = vmatpush.msra.mxu0 %v73_v4 }
  0x81   :  { %117 = vmatpush.msra.mxu0 %v70_v11 }
  0x83   :  { %118 = vmatpush.msra.mxu0 %v67_v5 }
  0x84   :  { %v61_v13 = vpop.permute.xlu0 %60  ;;  %v889_v25 = vpop.permute.xlu1 %83 }
  0x85   :  { %119 = vmatpush.msra.mxu0 %v64_v12 }
  0x87   :  { %120 = vmatpush.msra.mxu0 %v61_v13 }
  0x88   :  { %v918_v57 = vpop.permute.xlu2 %257 }
  0x89   :  { %121 = vmatpush.msra.mxu0 %v58_v0  ;;  %v55_v0 = vld [vmem:[%s1100_s7 + $0x10] sm:$0xff] }
  0x8a   :  { %672 = vmatmul.msk.f32.vlgmr.msra.gmra.mxu0 %vm96_vm0, %v851_v15 }
  0x8c   :  { %v895_v36 = vpop.permute.xlu0 %93 }
  0x8d   :  { %v910_v52 = vpop.permute.xlu1 %235 }
  0x91   :  { %v946_v8 = vpop.permute.xlu2 %287 }
  0x92   :  { %673 = vmatmul.msk.f32.gmra.mxu0 %vm96_vm0, %v858_v17 }
  0x95   :  { %v926_v62 = vpop.permute.xlu0 %261 }
  0x96   :  { %v916_v56 = vpop.permute.xlu1 %265 }
  0x9a   :  { %674 = vmatmul.msk.f32.gmra.mxu0 %vm96_vm0, %v865_v18  ;;  %v953_v11 = vpop.permute.xlu2 %220 }
  0x9e   :  { %v961_v16 = vpop.permute.xlu0 %202 }
  0x9f   :  { %v924_v61 = vpop.permute.xlu1 %295 }
  0xa2   :  { %v957_v13 = vpop.permute.xlu2 %215 }
  0xa7   :  { %v935_v3 = vpop.permute.xlu1 %291 }
  0xb0   :  { %v955_v12 = vpop.permute.xlu1 %197 }
  0xb8   :  { %v959_v14 = vpop.permute.xlu1 %192 }
  0xc0   :  { %v963_v21 = vpop.permute.xlu1 %210 }
 0x107   :  { %v123_v26 = vpop.f32.mrf.mxu0 }
 0x108   :  { %v124_v27 = vadd.f32 %v123_v26, %v889_v25 }
 0x10a   :  { %v135_v28 = vmin.f32 %v124_v27, 0.0  ;;  %vm132_vm3 = vcmp.gt.f32.partialorder %v124_v27, 0.0 }
 0x10c   :  { %v138_v29 = vmul.f32 1.442695, %v135_v28 }
 0x10e   :  { %732 = vpow2.f32 %v138_v29  ;;  %v971_v29 = vld [vmem:[%s1094_s0 + $0x8] sm:$0xff] }
 0x10f   :  { %v126_v31 = vpop.f32.mrf.mxu0 }
 0x110   :  { %v127_v32 = vadd.f32 %v126_v31, %v892_v30 }
 0x112   :  { %v136_v33 = vmin.f32 %v127_v32, 0.0  ;;  %vm133_vm4 = vcmp.gt.f32.partialorder %v127_v32, 0.0 }
 0x114   :  { %v733_v34 = vpop.eup %732  ;;  %v140_v35 = vmul.f32 1.442695, %v136_v33 }
 0x115   :  { %v675_v37 = vadd.f32 -1.0, %v733_v34 }
 0x116   :  { %734 = vpow2.f32 %v140_v35 }
 0x117   :  { %v129_v39 = vpop.f32.mrf.mxu0  ;;  %v147_v40 = vsel %vm132_vm3, %v124_v27, %v675_v37 }
 0x118   :  { %v130_v41 = vadd.f32 %v129_v39, %v895_v36  ;;  %679 = vmatmul.msk.f32.vlgmr.msra.gmra.mxu1 %vm150_vm2, %v147_v40 }
 0x11a   :  { %v137_v42 = vmin.f32 %v130_v41, 0.0  ;;  %vm134_vm5 = vcmp.gt.f32.partialorder %v130_v41, 0.0 }
 0x11c   :  { %v735_v43 = vpop.eup %734  ;;  %v142_v44 = vmul.f32 1.442695, %v137_v42 }
 0x11d   :  { %v676_v45 = vadd.f32 -1.0, %v735_v43 }
 0x11e   :  { %736 = vpow2.f32 %v142_v44 }
 0x11f   :  { %v148_v47 = vsel %vm133_vm4, %v127_v32, %v676_v45 }
 0x120   :  { %680 = vmatmul.msk.f32.gmra.mxu1 %vm150_vm2, %v148_v47 }
 0x124   :  { %v737_v48 = vpop.eup %736 }
 0x125   :  { %v677_v49 = vadd.f32 -1.0, %v737_v48  ;;  %v987_v48 = vld [vmem:[%s1101_s6] sm:$0xff] }
 0x127   :  { %v149_v50 = vsel %vm134_vm5, %v130_v41, %v677_v49  ;;  %v994_v49 = vld [vmem:[%s1101_s6 + $0x8] sm:$0xff] }
 0x128   :  { %681 = vmatmul.msk.f32.gmra.mxu1 %vm150_vm2, %v149_v50  ;;  %v1001_v50 = vld [vmem:[%s1101_s6 + $0x10] sm:$0xff] }
 0x195   :  { %v181_v54 = vpop.f32.mrf.mxu1 }
 0x196   :  { %v238_v55 = vmul.f32 %v912_v53, %v181_v54  ;;  %v268_v59 = vmul.f32 %v918_v57, %v181_v54  ;;  %v298_v9 = vmul.f32 %v946_v8, %v181_v54  ;;  %v205_v33 = vmul.f32 %v959_v14, %v181_v54 }
 0x198   :  { %244 = vrot.lane.b32.xlu1 %v238_v55, %s762_s21  ;;  %v223_v41 = vadd.f32 %v963_v21, %v205_v33 }
 0x19d   :  { %v184_v58 = vpop.f32.mrf.mxu1 }
 0x19e   :  { %v239_v60 = vmul.f32 %v908_v51, %v184_v58  ;;  %v269_v2 = vmul.f32 %v926_v62, %v184_v58  ;;  %v299_v5 = vmul.f32 %v935_v3, %v184_v58  ;;  %v206_v26 = vmul.f32 %v955_v12, %v184_v58 }
 0x1a0   :  { %274 = vrot.lane.b32.xlu1 %v268_v59, %s761_s20  ;;  %246 = vrot.lane.b32.xlu2 %v239_v60, %s762_s21  ;;  %v224_v31 = vadd.f32 %v957_v13, %v206_v26 }
 0x1a5   :  { %v187_v63 = vpop.f32.mrf.mxu1 }
 0x1a6   :  { %v240_v1 = vmul.f32 %v910_v52, %v187_v63  ;;  %v270_v4 = vmul.f32 %v916_v56, %v187_v63  ;;  %v300_v6 = vmul.f32 %v924_v61, %v187_v63  ;;  %v207_v23 = vmul.f32 %v961_v16, %v187_v63 }
 0x1a8   :  { %328 = vperm.xlu1 %730, %v55_v0   ;;  %248 = vrot.lane.b32.xlu0 %v240_v1, %s762_s21  ;;  %v225_v28 = vadd.f32 %v953_v11, %v207_v23 }
 0x1a9   :  { %276 = vrot.lane.b32.xlu2 %v269_v2, %s761_s20 }
 0x1b0   :  { %278 = vrot.lane.b32.xlu0 %v270_v4, %s761_s20  ;;  %438 = vrot.lane.b32.xlu1 %v971_v29, %s757_s16 }
 0x1b1   :  { %306 = vrot.lane.b32.xlu2 %v299_v5, %s758_s17 }
 0x1b8   :  { %308 = vrot.lane.b32.xlu0 %v300_v6, %s758_s17 }
 0x1b9   :  { %323 = vperm.xlu2 %731, %v54_v7  }
 0x1c0   :  { %304 = vrot.lane.b32.xlu0 %v298_v9, %s758_s17 }
 0x1c1   :  { %444 = vrot.lane.b32.xlu2 %v971_v29, %s756_s15 }
 0x1c8   :  { %318 = vperm.xlu0 %729, %v53_v10  }
 0x1c9   :  { %441 = vrot.lane.b32.xlu2 %v971_v29, %s759_s18 }
 0x1d0   :  { %435 = vrot.lane.b32.xlu0 %v971_v29, %s760_s19 }
 0x1fa   :  { %v247_v19 = vpop.permute.xlu2 %246 }
 0x1fb   :  { %v254_v34 = vadd.f32 %v247_v19, %v224_v31 }
 0x203   :  { %v277_v22 = vpop.permute.xlu2 %276 }
 0x204   :  { %v284_v39 = vadd.f32 %v277_v22, %v254_v34 }
 0x20a   :  { %v245_v27 = vpop.permute.xlu1 %244 }
 0x20b   :  { %v307_v37 = vpop.permute.xlu2 %306  ;;  %v253_v44 = vadd.f32 %v245_v27, %v223_v41 }
 0x20c   :  { %v314_v42 = vadd.f32 %v307_v37, %v284_v39 }
 0x212   :  { %v275_v43 = vpop.permute.xlu1 %274 }
 0x213   :  { %v283_v45 = vadd.f32 %v275_v43, %v253_v44  ;;  %v1008_v63 = vpop.permute.xlu2 %323 }
 0x21a   :  { %v249_v20 = vpop.permute.xlu0 %248  ;;  %v1011_v7 = vpop.permute.xlu1 %328 }
 0x21b   :  { %v255_v32 = vadd.f32 %v249_v20, %v225_v28 }
 0x222   :  { %v279_v24 = vpop.permute.xlu0 %278  ;;  %v439_v37 = vpop.permute.xlu1 %438 }
 0x223   :  { %v285_v35 = vadd.f32 %v279_v24, %v255_v32 }
 0x22a   :  { %v309_v38 = vpop.permute.xlu0 %308 }
 0x22b   :  { %v315_v40 = vadd.f32 %v309_v38, %v285_v35  ;;  %v445_v35 = vpop.permute.xlu2 %444 }
 0x22d   :  { %354 = vmatpush.msra.mxu2 %v315_v40 }
 0x22f   :  { %355 = vmatpush.msra.mxu2 %v314_v42 }
 0x232   :  { %v305_v46 = vpop.permute.xlu0 %304 }
 0x233   :  { %v313_v47 = vadd.f32 %v305_v46, %v283_v45  ;;  %v442_v39 = vpop.permute.xlu2 %441  ;;  %v1026_v46 = vld [vmem:[%s1102_s8] sm:$0xf] }
 0x235   :  { %356 = vmatpush.msra.mxu2 %v313_v47 }
 0x236   :  { %682 = vmatmul.msk.f32.vlgmr.msra.gmra.mxu2 %vm331_vm6, %v987_v48 }
 0x23a   :  { %v1005_v54 = vpop.permute.xlu0 %318 }
 0x23e   :  { %683 = vmatmul.msk.f32.gmra.mxu2 %vm331_vm6, %v994_v49 }
 0x242   :  { %v436_v38 = vpop.permute.xlu0 %435 }
 0x246   :  { %684 = vmatmul.msk.f32.gmra.mxu2 %vm331_vm6, %v1001_v50 }
 0x2b9   :  { %v358_v55 = vpop.f32.mrf.mxu2 }
 0x2ba   :  { %v359_v58 = vadd.f32 %v358_v55, %v1005_v54 }
 0x2bc   :  { %v370_v59 = vmin.f32 %v359_v58, 0.0  ;;  %vm367_vm8 = vcmp.gt.f32.partialorder %v359_v58, 0.0 }
 0x2be   :  { %v373_v60 = vmul.f32 1.442695, %v370_v59  ;;  %v1040_v59 = vld [vmem:[%s1103_s9] sm:$0xf]  ;;  %s767_s9 = smov 1  }
 0x2c0   :  { %738 = vpow2.f32 %v373_v60 }
 0x2c1   :  { %v361_v0 = vpop.f32.mrf.mxu2 }
 0x2c2   :  { %v362_v1 = vadd.f32 %v361_v0, %v1008_v63 }
 0x2c4   :  { %v371_v2 = vmin.f32 %v362_v1, 0.0  ;;  %vm368_vm9 = vcmp.gt.f32.partialorder %v362_v1, 0.0 }
 0x2c6   :  { %v739_v4 = vpop.eup %738  ;;  %v375_v5 = vmul.f32 1.442695, %v371_v2 }
 0x2c7   :  { %v685_v6 = vadd.f32 -1.0, %v739_v4 }
 0x2c8   :  { %740 = vpow2.f32 %v375_v5 }
 0x2c9   :  { %v364_v9 = vpop.f32.mrf.mxu2  ;;  %v382_v10 = vsel %vm367_vm8, %v359_v58, %v685_v6 }
 0x2ca   :  { %v365_v19 = vadd.f32 %v364_v9, %v1011_v7  ;;  %v386_v20 = vsel %vm385_vm7, %v382_v10, 0.0 }
 0x2cb   :  { %387 = vadd.xlane.f32.xlu2 %v386_v20 }
 0x2cc   :  { %v372_v22 = vmin.f32 %v365_v19, 0.0  ;;  %vm369_vm10 = vcmp.gt.f32.partialorder %v365_v19, 0.0 }
 0x2ce   :  { %v741_v23 = vpop.eup %740  ;;  %v377_v24 = vmul.f32 1.442695, %v372_v22 }
 0x2cf   :  { %v686_v26 = vadd.f32 -1.0, %v741_v23 }
 0x2d0   :  { %742 = vpow2.f32 %v377_v24 }
 0x2d1   :  { %v383_v27 = vsel %vm368_vm9, %v362_v1, %v686_v26 }
 0x2d2   :  { %v389_v28 = vsel %vm385_vm7, %v383_v27, 0.0 }
 0x2d3   :  { %390 = vadd.xlane.f32.xlu0 %v389_v28 }
 0x2d6   :  { %v743_v31 = vpop.eup %742 }
 0x2d7   :  { %v687_v32 = vadd.f32 -1.0, %v743_v31 }
 0x2d9   :  { %v384_v33 = vsel %vm369_vm10, %v365_v19, %v687_v32 }
 0x2da   :  { %v392_v34 = vsel %vm385_vm7, %v384_v33, 0.0 }
 0x2db   :  { %393 = vadd.xlane.f32.xlu1 %v392_v34 }
 0x2e3   :  { %432 = vrot.lane.b32.xlu2 %v971_v29, %s758_s17 }
 0x2e7   :  { %426 = vrot.lane.b32.xlu0 %v971_v29, %s762_s21 }
 0x2f4   :  { %429 = vrot.lane.b32.xlu1 %v971_v29, %s761_s20 }
 0x33e   :  { %v388_v43 = vpop.xlane.xlu2 %387 }
 0x33f   :  { %v395_v45 = vmul.f32 0.125, %v388_v43 }
 0x346   :  { %v391_v40 = vpop.xlane.xlu0 %390  ;;  %v433_v47 = vpop.permute.xlu2 %432 }
 0x347   :  { %v396_v44 = vmul.f32 0.125, %v391_v40 }
 0x34e   :  { %v394_v41 = vpop.xlane.xlu1 %393 }
 0x34f   :  { %v397_v42 = vmul.f32 0.125, %v394_v41 }
 0x351   :  { %414 = vmatpush.msra.mxu3 %v397_v42 }
 0x353   :  { %415 = vmatpush.msra.mxu3 %v396_v44 }
 0x355   :  { %416 = vmatpush.msra.mxu3 %v395_v45 }
 0x356   :  { %688 = vmatmul.msk.f32.vlgmr.msra.gmra.mxu3 %vm331_vm6, %v1026_v46 }
 0x357   :  { %455 = vmatpush.msrb.mxu3 %v445_v35 }
 0x359   :  { %456 = vmatpush.msrb.mxu3 %v442_v39  ;;  %v427_v58 = vpop.permute.xlu0 %426 }
 0x35b   :  { %457 = vmatpush.msrb.mxu3 %v439_v37 }
 0x35d   :  { %458 = vmatpush.msrb.mxu3 %v436_v38 }
 0x35f   :  { %459 = vmatpush.msrb.mxu3 %v433_v47 }
 0x366   :  { %v430_v55 = vpop.permute.xlu1 %429 }
 0x367   :  { %460 = vmatpush.msrb.mxu3 %v430_v55 }
 0x369   :  { %461 = vmatpush.msrb.mxu3 %v427_v58 }
 0x36b   :  { %462 = vmatpush.msrb.mxu3 %v971_v29 }
 0x36c   :  { %690 = vmatmul.msk.f32.vlgmr.msrb.gmra.mxu3 %vm96_vm0, %v851_v15 }
 0x374   :  { %691 = vmatmul.msk.f32.gmra.mxu3 %vm96_vm0, %v858_v17 }
 0x37c   :  { %692 = vmatmul.msk.f32.gmra.mxu3 %vm96_vm0, %v865_v18 }
 0x3d9   :  { %v418_v60 = vpop.f32.mrf.mxu3 }
 0x3da   :  { %v419_v0 = vadd.f32 %v418_v60, %v1040_v59 }
 0x3dc   :  { %422 = vst.msk [vmem:[%s1104_s10] sm:$0xf] %vm421_vm11, %v419_v0 }
 0x3ef   :  { %v464_v15 = vpop.f32.mrf.mxu3 }
 0x3f0   :  { %v465_v29 = vadd.f32 %v464_v15, %v889_v25 }
 0x3f2   :  { %v476_v17 = vmin.f32 %v465_v29, 0.0  ;;  %vm473_vm12 = vcmp.gt.f32.partialorder %v465_v29, 0.0 }
 0x3f4   :  { %v479_v1 = vmul.f32 1.442695, %v476_v17 }
 0x3f6   :  { %744 = vpow2.f32 %v479_v1 }
 0x3f7   :  { %v467_v18 = vpop.f32.mrf.mxu3 }
 0x3f8   :  { %v468_v2 = vadd.f32 %v467_v18, %v892_v30 }
 0x3fa   :  { %v477_v4 = vmin.f32 %v468_v2, 0.0  ;;  %vm474_vm13 = vcmp.gt.f32.partialorder %v468_v2, 0.0 }
 0x3fc   :  { %v745_v5 = vpop.eup %744  ;;  %v481_v6 = vmul.f32 1.442695, %v477_v4 }
 0x3fd   :  { %v693_v9 = vadd.f32 -1.0, %v745_v5 }
 0x3fe   :  { %746 = vpow2.f32 %v481_v6 }
 0x3ff   :  { %v470_v10 = vpop.f32.mrf.mxu3  ;;  %v488_v19 = vsel %vm473_vm12, %v465_v29, %v693_v9 }
 0x400   :  { %v471_v20 = vadd.f32 %v470_v10, %v895_v36  ;;  %697 = vmatmul.msk.f32.vlgmr.msrb.gmra.mxu1 %vm150_vm2, %v488_v19 }
 0x402   :  { %v478_v22 = vmin.f32 %v471_v20, 0.0  ;;  %vm475_vm14 = vcmp.gt.f32.partialorder %v471_v20, 0.0 }
 0x404   :  { %v747_v25 = vpop.eup %746  ;;  %v483_v23 = vmul.f32 1.442695, %v478_v22 }
 0x405   :  { %v694_v24 = vadd.f32 -1.0, %v747_v25 }
 0x406   :  { %748 = vpow2.f32 %v483_v23 }
 0x407   :  { %v489_v26 = vsel %vm474_vm13, %v468_v2, %v694_v24 }
 0x408   :  { %698 = vmatmul.msk.f32.gmra.mxu1 %vm150_vm2, %v489_v26 }
 0x40c   :  { %v749_v30 = vpop.eup %748 }
 0x40d   :  { %v695_v27 = vadd.f32 -1.0, %v749_v30 }
 0x40f   :  { %v490_v28 = vsel %vm475_vm14, %v471_v20, %v695_v27 }
 0x410   :  { %699 = vmatmul.msk.f32.gmra.mxu1 %vm150_vm2, %v490_v28  ;;  %vm666_vm2 = vcmask 11272  }
 0x47d   :  { %v517_v31 = vpop.f32.mrf.mxu1 }
 0x47e   :  { %v532_v36 = vmul.f32 %v517_v31, %v912_v53  ;;  %v526_v44 = vmul.f32 %v517_v31, %v959_v14 }
 0x480   :  { %538 = vrot.lane.b32.xlu1 %v532_v36, %s762_s21  ;;  %v529_v58 = vadd.f32 %v526_v44, %v963_v21 }
 0x485   :  { %v520_v32 = vpop.f32.mrf.mxu1 }
 0x486   :  { %v533_v33 = vmul.f32 %v520_v32, %v908_v51  ;;  %v551_v38 = vmul.f32 %v520_v32, %v926_v62  ;;  %v569_v39 = vmul.f32 %v520_v32, %v935_v3  ;;  %v550_v51 = vmul.f32 %v517_v31, %v918_v57 }
 0x488   :  { %540 = vrot.lane.b32.xlu0 %v533_v33, %s762_s21 }
 0x48d   :  { %v523_v34 = vpop.f32.mrf.mxu1 }
 0x48e   :  { %v534_v35 = vmul.f32 %v523_v34, %v910_v52  ;;  %v552_v37 = vmul.f32 %v523_v34, %v916_v56  ;;  %v570_v53 = vmul.f32 %v523_v34, %v924_v61  ;;  %v568_v52 = vmul.f32 %v517_v31, %v946_v8 }
 0x48f   :  { %v528_v41 = vmul.f32 %v523_v34, %v961_v16  ;;  %v527_v61 = vmul.f32 %v520_v32, %v955_v12 }
 0x490   :  { %558 = vrot.lane.b32.xlu0 %v551_v38, %s761_s20  ;;  %560 = vrot.lane.b32.xlu2 %v552_v37, %s761_s20 }
 0x491   :  { %542 = vrot.lane.b32.xlu1 %v534_v35, %s762_s21  ;;  %v531_v57 = vadd.f32 %v528_v41, %v953_v11  ;;  %v530_v47 = vadd.f32 %v527_v61, %v957_v13 }
 0x498   :  { %576 = vrot.lane.b32.xlu0 %v569_v39, %s758_s17  ;;  %578 = vrot.lane.b32.xlu2 %v570_v53, %s758_s17 }
 0x499   :  { %556 = vrot.lane.b32.xlu1 %v550_v51, %s761_s20 }
 0x4a0   :  { %574 = vrot.lane.b32.xlu2 %v568_v52, %s758_s17 }
 0x4ea   :  { %v561_v56 = vpop.permute.xlu2 %560 }
 0x4f2   :  { %v539_v40 = vpop.permute.xlu1 %538  ;;  %v579_v42 = vpop.permute.xlu2 %578 }
 0x4f3   :  { %v547_v15 = vadd.f32 %v539_v40, %v529_v58 }
 0x4fa   :  { %v541_v62 = vpop.permute.xlu0 %540  ;;  %v575_v11 = vpop.permute.xlu2 %574 }
 0x4fb   :  { %v548_v55 = vadd.f32 %v541_v62, %v530_v47 }
 0x502   :  { %v559_v3 = vpop.permute.xlu0 %558 }
 0x503   :  { %v543_v43 = vpop.permute.xlu1 %542  ;;  %v566_v0 = vadd.f32 %v559_v3, %v548_v55 }
 0x504   :  { %v549_v45 = vadd.f32 %v543_v43, %v531_v57 }
 0x506   :  { %v567_v8 = vadd.f32 %v561_v56, %v549_v45 }
 0x508   :  { %v585_v60 = vadd.f32 %v579_v42, %v567_v8 }
 0x50a   :  { %599 = vmatpush.msrb.mxu2 %v585_v60  ;;  %v577_v16 = vpop.permute.xlu0 %576 }
 0x50b   :  { %v584_v12 = vadd.f32 %v577_v16, %v566_v0  ;;  %v557_v29 = vpop.permute.xlu1 %556 }
 0x50c   :  { %v565_v17 = vadd.f32 %v557_v29, %v547_v15 }
 0x50d   :  { %600 = vmatpush.msrb.mxu2 %v584_v12 }
 0x50e   :  { %v583_v1 = vadd.f32 %v575_v11, %v565_v17 }
 0x510   :  { %601 = vmatpush.msrb.mxu2 %v583_v1 }
 0x511   :  { %700 = vmatmul.msk.f32.vlgmr.msrb.gmra.mxu2 %vm331_vm6, %v987_v48 }
 0x519   :  { %701 = vmatmul.msk.f32.gmra.mxu2 %vm331_vm6, %v994_v49 }
 0x521   :  { %702 = vmatmul.msk.f32.gmra.mxu2 %vm331_vm6, %v1001_v50 }
 0x594   :  { %v603_v13 = vpop.f32.mrf.mxu2 }
 0x595   :  { %v604_v14 = vadd.f32 %v603_v13, %v1005_v54 }
 0x597   :  { %v615_v21 = vmin.f32 %v604_v14, 0.0  ;;  %vm612_vm15 = vcmp.gt.f32.partialorder %v604_v14, 0.0 }
 0x599   :  { %v618_v18 = vmul.f32 1.442695, %v615_v21 }
 0x59b   :  { %750 = vpow2.f32 %v618_v18 }
 0x59c   :  { %v606_v2 = vpop.f32.mrf.mxu2 }
 0x59d   :  { %v607_v4 = vadd.f32 %v606_v2, %v1008_v63 }
 0x59f   :  { %v616_v5 = vmin.f32 %v607_v4, 0.0  ;;  %vm613_vm0 = vcmp.gt.f32.partialorder %v607_v4, 0.0 }
 0x5a1   :  { %v751_v6 = vpop.eup %750  ;;  %v620_v9 = vmul.f32 1.442695, %v616_v5 }
 0x5a2   :  { %v703_v10 = vadd.f32 -1.0, %v751_v6 }
 0x5a3   :  { %752 = vpow2.f32 %v620_v9 }
 0x5a4   :  { %v609_v48 = vpop.f32.mrf.mxu2  ;;  %v627_v49 = vsel %vm612_vm15, %v604_v14, %v703_v10 }
 0x5a5   :  { %v610_v19 = vadd.f32 %v609_v48, %v1011_v7  ;;  %v630_v50 = vsel %vm385_vm7, %v627_v49, 0.0 }
 0x5a6   :  { %631 = vadd.xlane.f32.xlu2 %v630_v50 }
 0x5a7   :  { %v617_v54 = vmin.f32 %v610_v19, 0.0  ;;  %vm614_vm1 = vcmp.gt.f32.partialorder %v610_v19, 0.0 }
 0x5a9   :  { %v753_v20 = vpop.eup %752  ;;  %v622_v22 = vmul.f32 1.442695, %v617_v54 }
 0x5aa   :  { %v704_v25 = vadd.f32 -1.0, %v753_v20 }
 0x5ab   :  { %754 = vpow2.f32 %v622_v22 }
 0x5ac   :  { %v628_v63 = vsel %vm613_vm0, %v607_v4, %v704_v25 }
 0x5ad   :  { %v633_v23 = vsel %vm385_vm7, %v628_v63, 0.0 }
 0x5ae   :  { %634 = vadd.xlane.f32.xlu0 %v633_v23 }
 0x5b1   :  { %v755_v24 = vpop.eup %754 }
 0x5b2   :  { %v705_v26 = vadd.f32 -1.0, %v755_v24 }
 0x5b4   :  { %v629_v30 = vsel %vm614_vm1, %v610_v19, %v705_v26 }
 0x5b5   :  { %v636_v27 = vsel %vm385_vm7, %v629_v30, 0.0 }
 0x5b6   :  { %637 = vadd.xlane.f32.xlu1 %v636_v27 }
 0x619   :  { %v632_v36 = vpop.xlane.xlu2 %631 }
 0x61a   :  { %v639_v33 = vmul.f32 0.125, %v632_v36 }
 0x621   :  { %v635_v7 = vpop.xlane.xlu0 %634 }
 0x622   :  { %v640_v32 = vmul.f32 0.125, %v635_v7 }
 0x629   :  { %v638_v28 = vpop.xlane.xlu1 %637 }
 0x62a   :  { %v641_v31 = vmul.f32 0.125, %v638_v28 }
 0x62c   :  { %655 = vmatpush.msrb.mxu0 %v641_v31 }
 0x62e   :  { %656 = vmatpush.msrb.mxu0 %v640_v32 }
 0x630   :  { %657 = vmatpush.msrb.mxu0 %v639_v33 }
 0x631   :  { %706 = vmatmul.msk.f32.vlgmr.msrb.gmra.mxu0 %vm331_vm6, %v1026_v46 }
 0x6ae   :  { %v659_v34 = vpop.f32.mrf.mxu0 }
 0x6af   :  { %v660_v35 = vadd.f32 %v659_v34, %v1040_v59 }
 0x6b1   :  { %663 = vrot.lane.b32.xlu1 %v660_v35, %s767_s9 }
 0x723   :  { %v664_v37 = vpop.permute.xlu1 %663 }
 0x724   :  { %667 = vst.msk [vmem:[%s1104_s10] sm:$0xf] %vm666_vm2, %v664_v37 }

</bundles_post_ra>
